<compile_context>
chip_gen: v5e
topology: v5e:2x2
jax: 0.10.0
libtpu: 0.0.40
codegen_flags: <defaults>
</compile_context>

<pallas_src>
import functools

import jax
import jax.numpy as jnp
from jax.experimental import pallas as pl
from jax.experimental.pallas import tpu as pltpu

LANE = 128      # lane-dense channel padding target
SUBLANE = 8     # sublane alignment for node counts


def _round_up(n, m):
    return ((n + m - 1) // m) * m


def _pad_to(x, target_shape):
    pads = [(0, t - s) for s, t in zip(x.shape, target_shape)]
    if all(p == (0, 0) for p in pads):
        return x
    return jnp.pad(x, pads)


def _residual_kernel(
    # inputs (per-graph blocks, leading batch dim squeezed)
    hd_ref, hp_ref,
    a_p2d_ref, a_d2p_ref, a_p2p_ref,
    w1d_ref, w1p_ref, w2d_ref, w2p_ref,
    # outputs
    od_ref, op_ref,
    *,
    pass_d2p_msg, pass_p2d_msg, pass_p2p_msg, drug_self_loop, prot_self_loop,
):
    hd = hd_ref[...]   # (Nd_pad, Cd_pad)
    hp = hp_ref[...]   # (Np_pad, Cp_pad)

    def conv(h_d, h_p, wd_fused, wp_fused):
        # --- drug output: one fused matmul over concatenated features ------
        feats_d = []
        if drug_self_loop:
            feats_d.append(h_d)
        if pass_p2d_msg:
            agg = jnp.dot(a_p2d_ref[...], h_p,
                          preferred_element_type=jnp.float32)
            feats_d.append(agg.astype(h_d.dtype))
        if feats_d:
            feat_d = (feats_d[0] if len(feats_d) == 1
                      else jnp.concatenate(feats_d, axis=-1))
            out_d = jnp.dot(feat_d, wd_fused,
                            preferred_element_type=jnp.float32)
        else:
            out_d = jnp.zeros(h_d.shape, jnp.float32)

        # --- protein output -------------------------------------------------
        feats_p = []
        if prot_self_loop:
            feats_p.append(h_p)
        if pass_d2p_msg:
            agg = jnp.dot(a_d2p_ref[...], h_d,
                          preferred_element_type=jnp.float32)
            feats_p.append(agg.astype(h_p.dtype))
        if pass_p2p_msg:
            agg = jnp.dot(a_p2p_ref[...], h_p,
                          preferred_element_type=jnp.float32)
            feats_p.append(agg.astype(h_p.dtype))
        if feats_p:
            feat_p = (feats_p[0] if len(feats_p) == 1
                      else jnp.concatenate(feats_p, axis=-1))
            out_p = jnp.dot(feat_p, wp_fused,
                            preferred_element_type=jnp.float32)
        else:
            out_p = jnp.zeros(h_p.shape, jnp.float32)
        return out_d, out_p

    # conv1 -> relu (relu in f32; cast once for conv2's MXU operands)
    d1, p1 = conv(hd, hp, w1d_ref[...], w1p_ref[...])
    d1 = jnp.maximum(d1, 0.0).astype(hd.dtype)
    p1 = jnp.maximum(p1, 0.0).astype(hp.dtype)

    # conv2
    d2, p2 = conv(d1, p1, w2d_ref[...], w2p_ref[...])

    # residual + relu, single cast at the store
    od_ref[...] = jnp.maximum(hd.astype(jnp.float32) + d2, 0.0).astype(od_ref.dtype)
    op_ref[...] = jnp.maximum(hp.astype(jnp.float32) + p2, 0.0).astype(op_ref.dtype)


def residual_module(h_drug, h_prot, adj, params, *,
                    pass_d2p_msg=True, pass_p2d_msg=True, pass_p2p_msg=True,
                    drug_self_loop=True, prot_self_loop=True):
    """Fused ResidualModule forward for a batch of B graphs.

    h_drug: (B, Nd, Cd), h_prot: (B, Np, Cp)
    adj = (A_p2d (B,Nd,Np), A_d2p (B,Np,Nd), A_p2p (B,Np,Np))
    params = 10 weight matrices (conv1 then conv2): Wdd, Wpd, Wps, Wdp, Wpp.
    """
    a_p2d, a_d2p, a_p2p = adj
    (w1dd, w1pd, w1ps, w1dp, w1pp,
     w2dd, w2pd, w2ps, w2dp, w2pp) = params

    B, nd, cd = h_drug.shape
    _, np_, cp = h_prot.shape

    # Lane-dense / sublane-aligned padded sizes.
    nd_p = _round_up(max(nd, SUBLANE), SUBLANE)
    np_p = _round_up(max(np_, SUBLANE), SUBLANE)
    cd_p = _round_up(max(cd, LANE), LANE)
    cp_p = _round_up(max(cp, LANE), LANE)

    hd = _pad_to(h_drug, (B, nd_p, cd_p))
    hp = _pad_to(h_prot, (B, np_p, cp_p))
    ap2d = _pad_to(a_p2d, (B, nd_p, np_p))
    ad2p = _pad_to(a_d2p, (B, np_p, nd_p))
    ap2p = _pad_to(a_p2p, (B, np_p, np_p))

    # Pre-fuse (concatenate) projection weights along the contraction axis,
    # ordered to match the in-kernel feature concat. Done once in the wrapper.
    def fuse_drug(wdd, wpd):
        parts = []
        if drug_self_loop:
            parts.append(_pad_to(wdd, (cd_p, cd_p)))
        if pass_p2d_msg:
            parts.append(_pad_to(wpd, (cp_p, cd_p)))
        if not parts:
            return jnp.zeros((cd_p, cd_p), h_drug.dtype)  # unused placeholder
        return jnp.concatenate(parts, axis=0)

    def fuse_prot(wps, wdp, wpp):
        parts = []
        if prot_self_loop:
            parts.append(_pad_to(wps, (cp_p, cp_p)))
        if pass_d2p_msg:
            parts.append(_pad_to(wdp, (cd_p, cp_p)))
        if pass_p2p_msg:
            parts.append(_pad_to(wpp, (cp_p, cp_p)))
        if not parts:
            return jnp.zeros((cp_p, cp_p), h_prot.dtype)  # unused placeholder
        return jnp.concatenate(parts, axis=0)

    w1d_f = fuse_drug(w1dd, w1pd)
    w1p_f = fuse_prot(w1ps, w1dp, w1pp)
    w2d_f = fuse_drug(w2dd, w2pd)
    w2p_f = fuse_prot(w2ps, w2dp, w2pp)

    kernel = functools.partial(
        _residual_kernel,
        pass_d2p_msg=pass_d2p_msg, pass_p2d_msg=pass_p2d_msg,
        pass_p2p_msg=pass_p2p_msg, drug_self_loop=drug_self_loop,
        prot_self_loop=prot_self_loop,
    )

    def node_spec(n, c):
        # one graph per grid step; leading batch dim squeezed out of the ref
        return pl.BlockSpec((None, n, c), lambda b: (b, 0, 0))

    def weight_spec(w):
        # shared across all graphs -> same block every step (no re-DMA)
        return pl.BlockSpec(w.shape, lambda b: (0, 0))

    # TODO(synk): for very large Np (realistic protein graphs) A_p2p should be
    # tiled over (dst, src) node tiles with an accumulator instead of being a
    # single resident block (mandatory on v7x's 64 MiB VMEM).
    out_d_pad, out_p_pad = pl.pallas_call(
        kernel,
        out_shape=(jax.ShapeDtypeStruct((B, nd_p, cd_p), h_drug.dtype),
                   jax.ShapeDtypeStruct((B, np_p, cp_p), h_prot.dtype)),
        grid=(B,),
        in_specs=[node_spec(nd_p, cd_p), node_spec(np_p, cp_p),
                  node_spec(nd_p, np_p), node_spec(np_p, nd_p),
                  node_spec(np_p, np_p),
                  weight_spec(w1d_f), weight_spec(w1p_f),
                  weight_spec(w2d_f), weight_spec(w2p_f)],
        out_specs=(node_spec(nd_p, cd_p), node_spec(np_p, cp_p)),
        compiler_params=pltpu.CompilerParams(
            dimension_semantics=("parallel",),
            vmem_limit_bytes=64 * 1024 * 1024,
        ),
    )(hd, hp, ap2d, ad2p, ap2p, w1d_f, w1p_f, w2d_f, w2p_f)

    return out_d_pad[:, :nd, :cd], out_p_pad[:, :np_, :cp]


# ---------------------------------------------------------------------------
# Pure-JAX reference (same math, no Pallas) for a correctness check.
# ---------------------------------------------------------------------------
def residual_module_ref(h_drug, h_prot, adj, params):
    a_p2d, a_d2p, a_p2p = adj
    (w1dd, w1pd, w1ps, w1dp, w1pp,
     w2dd, w2pd, w2ps, w2dp, w2pp) = params

    def conv(hd, hp, wdd, wpd, wps, wdp, wpp):
        od = hd @ wdd + (a_p2d @ hp) @ wpd
        op = hp @ wps + (a_d2p @ hd) @ wdp + (a_p2p @ hp) @ wpp
        return od, op

    d1, p1 = conv(h_drug, h_prot, w1dd, w1pd, w1ps, w1dp, w1pp)
    d1, p1 = jax.nn.relu(d1), jax.nn.relu(p1)
    d2, p2 = conv(d1, p1, w2dd, w2pd, w2ps, w2dp, w2pp)
    return jax.nn.relu(h_drug + d2), jax.nn.relu(h_prot + p2)


def _glorot(key, shape):
    fan_in, fan_out = shape
    limit = (6.0 / (fan_in + fan_out)) ** 0.5
    return jax.random.uniform(key, shape, jnp.float32, -limit, limit)


if __name__ == "__main__":
    # Small synthetic problem: batch of 4 graphs, 8 drug nodes, 16 protein
    # nodes, 32 channels each (channels are padded to 128 internally).
    B, Nd, Np = 4, 8, 16
    Cd, Cp = 32, 32

    key = jax.random.PRNGKey(0)
    keys = jax.random.split(key, 16)

    h_drug = jax.random.normal(keys[0], (B, Nd, Cd), jnp.float32)
    h_prot = jax.random.normal(keys[1], (B, Np, Cp), jnp.float32)

    # Deterministic dense adjacencies (row-normalized message aggregation).
    def norm_adj(k, shape):
        a = (jax.random.uniform(k, shape) > 0.6).astype(jnp.float32)
        deg = jnp.maximum(a.sum(axis=-1, keepdims=True), 1.0)
        return a / deg

    a_p2d = norm_adj(keys[2], (B, Nd, Np))   # protein -> drug aggregation
    a_d2p = norm_adj(keys[3], (B, Np, Nd))   # drug -> protein aggregation
    a_p2p = norm_adj(keys[4], (B, Np, Np))   # protein -> protein aggregation
    adj = (a_p2d, a_d2p, a_p2p)

    # conv1 + conv2 weights (Glorot-uniform, deterministic, shared per batch).
    params = (
        _glorot(keys[5], (Cd, Cd)),   # W1_dd  (drug self loop)
        _glorot(keys[6], (Cp, Cd)),   # W1_pd  (prot -> drug)
        _glorot(keys[7], (Cp, Cp)),   # W1_ps  (prot self loop)
        _glorot(keys[8], (Cd, Cp)),   # W1_dp  (drug -> prot)
        _glorot(keys[9], (Cp, Cp)),   # W1_pp  (prot -> prot)
        _glorot(keys[10], (Cd, Cd)),  # W2_dd
        _glorot(keys[11], (Cp, Cd)),  # W2_pd
        _glorot(keys[12], (Cp, Cp)),  # W2_ps
        _glorot(keys[13], (Cd, Cp)),  # W2_dp
        _glorot(keys[14], (Cp, Cp)),  # W2_pp
    )

    out_drug, out_prot = residual_module(h_drug, h_prot, adj, params)
    out_drug = jax.block_until_ready(out_drug)
    out_prot = jax.block_until_ready(out_prot)

    ref_drug, ref_prot = residual_module_ref(h_drug, h_prot, adj, params)
    assert out_drug.shape == ref_drug.shape and out_prot.shape == ref_prot.shape
    assert jnp.allclose(out_drug, ref_drug, atol=1e-4, rtol=1e-4)
    assert jnp.allclose(out_prot, ref_prot, atol=1e-4, rtol=1e-4)

    print("KERNEL_OK")
</pallas_src>

<mosaic_0001>
module attributes {stable_mosaic.version = 11 : i64} {
  func.func @_residual_kernel(%arg0: i32, %arg1: memref<1x8x128xf32, #tpu.memory_space<vmem>>, %arg2: memref<1x16x128xf32, #tpu.memory_space<vmem>>, %arg3: memref<1x8x16xf32, #tpu.memory_space<vmem>>, %arg4: memref<1x16x8xf32, #tpu.memory_space<vmem>>, %arg5: memref<1x16x16xf32, #tpu.memory_space<vmem>>, %arg6: memref<256x128xf32, #tpu.memory_space<vmem>>, %arg7: memref<384x128xf32, #tpu.memory_space<vmem>>, %arg8: memref<256x128xf32, #tpu.memory_space<vmem>>, %arg9: memref<384x128xf32, #tpu.memory_space<vmem>>, %arg10: memref<1x8x128xf32, #tpu.memory_space<vmem>>, %arg11: memref<1x16x128xf32, #tpu.memory_space<vmem>>) attributes {dimension_semantics = [#tpu.dimension_semantics<parallel>], iteration_bounds = array<i64: 4>, scalar_prefetch = 0 : i64, scratch_operands = 0 : i64, tpu.core_type = #tpu.core_type<tc>, window_params = [{transform_indices = @transform_0, window_bounds = array<i64: 1, 8, 128>}, {transform_indices = @transform_1, window_bounds = array<i64: 1, 16, 128>}, {transform_indices = @transform_2, window_bounds = array<i64: 1, 8, 16>}, {transform_indices = @transform_3, window_bounds = array<i64: 1, 16, 8>}, {transform_indices = @transform_4, window_bounds = array<i64: 1, 16, 16>}, {pipeline_mode = #tpu.pipeline_mode<synchronous>, transform_indices = @transform_5, window_bounds = array<i64: 256, 128>}, {pipeline_mode = #tpu.pipeline_mode<synchronous>, transform_indices = @transform_6, window_bounds = array<i64: 384, 128>}, {pipeline_mode = #tpu.pipeline_mode<synchronous>, transform_indices = @transform_7, window_bounds = array<i64: 256, 128>}, {pipeline_mode = #tpu.pipeline_mode<synchronous>, transform_indices = @transform_8, window_bounds = array<i64: 384, 128>}, {transform_indices = @transform_9, window_bounds = array<i64: 1, 8, 128>}, {transform_indices = @transform_10, window_bounds = array<i64: 1, 16, 128>}]} {
    %c0 = arith.constant 0 : index
    %c0_0 = arith.constant 0 : index
    %c0_1 = arith.constant 0 : index
    %0 = vector.load %arg1[%c0, %c0_0, %c0_1] : memref<1x8x128xf32, #tpu.memory_space<vmem>>, vector<1x8x128xf32>
    %1 = vector.shape_cast %0 : vector<1x8x128xf32> to vector<8x128xf32>
    %c0_2 = arith.constant 0 : index
    %c0_3 = arith.constant 0 : index
    %c0_4 = arith.constant 0 : index
    %2 = vector.load %arg2[%c0_2, %c0_3, %c0_4] : memref<1x16x128xf32, #tpu.memory_space<vmem>>, vector<1x16x128xf32>
    %3 = vector.shape_cast %2 : vector<1x16x128xf32> to vector<16x128xf32>
    %c0_5 = arith.constant 0 : index
    %c0_6 = arith.constant 0 : index
    %4 = vector.load %arg6[%c0_5, %c0_6] : memref<256x128xf32, #tpu.memory_space<vmem>>, vector<256x128xf32>
    %c0_7 = arith.constant 0 : index
    %c0_8 = arith.constant 0 : index
    %5 = vector.load %arg7[%c0_7, %c0_8] : memref<384x128xf32, #tpu.memory_space<vmem>>, vector<384x128xf32>
    %c0_9 = arith.constant 0 : index
    %c0_10 = arith.constant 0 : index
    %c0_11 = arith.constant 0 : index
    %6 = vector.load %arg3[%c0_9, %c0_10, %c0_11] : memref<1x8x16xf32, #tpu.memory_space<vmem>>, vector<1x8x16xf32>
    %7 = vector.shape_cast %6 : vector<1x8x16xf32> to vector<8x16xf32>
    %cst = arith.constant dense<0.000000e+00> : vector<8x128xf32>
    %8 = tpu.matmul %7, %3, %cst {dimension_numbers = #tpu.dot_dimension_numbers<[1], [0], [0], [1], [0, 0, 1, 1], [], []>} : vector<8x16xf32>, vector<16x128xf32>, vector<8x128xf32> -> vector<8x128xf32>
    %9 = tpu.concatenate %1, %8 in 1 : vector<8x128xf32>, vector<8x128xf32> -> vector<8x256xf32>
    %cst_12 = arith.constant dense<0.000000e+00> : vector<8x128xf32>
    %10 = tpu.matmul %9, %4, %cst_12 {dimension_numbers = #tpu.dot_dimension_numbers<[1], [0], [0], [1], [0, 0, 1, 1], [], []>} : vector<8x256xf32>, vector<256x128xf32>, vector<8x128xf32> -> vector<8x128xf32>
    %c0_13 = arith.constant 0 : index
    %c0_14 = arith.constant 0 : index
    %c0_15 = arith.constant 0 : index
    %11 = vector.load %arg4[%c0_13, %c0_14, %c0_15] : memref<1x16x8xf32, #tpu.memory_space<vmem>>, vector<1x16x8xf32>
    %12 = vector.shape_cast %11 : vector<1x16x8xf32> to vector<16x8xf32>
    %cst_16 = arith.constant dense<0.000000e+00> : vector<16x128xf32>
    %13 = tpu.matmul %12, %1, %cst_16 {dimension_numbers = #tpu.dot_dimension_numbers<[1], [0], [0], [1], [0, 0, 1, 1], [], []>} : vector<16x8xf32>, vector<8x128xf32>, vector<16x128xf32> -> vector<16x128xf32>
    %c0_17 = arith.constant 0 : index
    %c0_18 = arith.constant 0 : index
    %c0_19 = arith.constant 0 : index
    %14 = vector.load %arg5[%c0_17, %c0_18, %c0_19] : memref<1x16x16xf32, #tpu.memory_space<vmem>>, vector<1x16x16xf32>
    %15 = vector.shape_cast %14 : vector<1x16x16xf32> to vector<16x16xf32>
    %cst_20 = arith.constant dense<0.000000e+00> : vector<16x128xf32>
    %16 = tpu.matmul %15, %3, %cst_20 {dimension_numbers = #tpu.dot_dimension_numbers<[1], [0], [0], [1], [0, 0, 1, 1], [], []>} : vector<16x16xf32>, vector<16x128xf32>, vector<16x128xf32> -> vector<16x128xf32>
    %17 = tpu.concatenate %3, %13, %16 in 1 : vector<16x128xf32>, vector<16x128xf32>, vector<16x128xf32> -> vector<16x384xf32>
    %cst_21 = arith.constant dense<0.000000e+00> : vector<16x128xf32>
    %18 = tpu.matmul %17, %5, %cst_21 {dimension_numbers = #tpu.dot_dimension_numbers<[1], [0], [0], [1], [0, 0, 1, 1], [], []>} : vector<16x384xf32>, vector<384x128xf32>, vector<16x128xf32> -> vector<16x128xf32>
    %cst_22 = arith.constant 0.000000e+00 : f32
    %19 = vector.broadcast %cst_22 : f32 to vector<8x128xf32>
    %20 = arith.maximumf %10, %19 : vector<8x128xf32>
    %cst_23 = arith.constant 0.000000e+00 : f32
    %21 = vector.broadcast %cst_23 : f32 to vector<16x128xf32>
    %22 = arith.maximumf %18, %21 : vector<16x128xf32>
    %c0_24 = arith.constant 0 : index
    %c0_25 = arith.constant 0 : index
    %23 = vector.load %arg8[%c0_24, %c0_25] : memref<256x128xf32, #tpu.memory_space<vmem>>, vector<256x128xf32>
    %c0_26 = arith.constant 0 : index
    %c0_27 = arith.constant 0 : index
    %24 = vector.load %arg9[%c0_26, %c0_27] : memref<384x128xf32, #tpu.memory_space<vmem>>, vector<384x128xf32>
    %c0_28 = arith.constant 0 : index
    %c0_29 = arith.constant 0 : index
    %c0_30 = arith.constant 0 : index
    %25 = vector.load %arg3[%c0_28, %c0_29, %c0_30] : memref<1x8x16xf32, #tpu.memory_space<vmem>>, vector<1x8x16xf32>
    %26 = vector.shape_cast %25 : vector<1x8x16xf32> to vector<8x16xf32>
    %cst_31 = arith.constant dense<0.000000e+00> : vector<8x128xf32>
    %27 = tpu.matmul %26, %22, %cst_31 {dimension_numbers = #tpu.dot_dimension_numbers<[1], [0], [0], [1], [0, 0, 1, 1], [], []>} : vector<8x16xf32>, vector<16x128xf32>, vector<8x128xf32> -> vector<8x128xf32>
    %28 = tpu.concatenate %20, %27 in 1 : vector<8x128xf32>, vector<8x128xf32> -> vector<8x256xf32>
    %cst_32 = arith.constant dense<0.000000e+00> : vector<8x128xf32>
    %29 = tpu.matmul %28, %23, %cst_32 {dimension_numbers = #tpu.dot_dimension_numbers<[1], [0], [0], [1], [0, 0, 1, 1], [], []>} : vector<8x256xf32>, vector<256x128xf32>, vector<8x128xf32> -> vector<8x128xf32>
    %c0_33 = arith.constant 0 : index
    %c0_34 = arith.constant 0 : index
    %c0_35 = arith.constant 0 : index
    %30 = vector.load %arg4[%c0_33, %c0_34, %c0_35] : memref<1x16x8xf32, #tpu.memory_space<vmem>>, vector<1x16x8xf32>
    %31 = vector.shape_cast %30 : vector<1x16x8xf32> to vector<16x8xf32>
    %cst_36 = arith.constant dense<0.000000e+00> : vector<16x128xf32>
    %32 = tpu.matmul %31, %20, %cst_36 {dimension_numbers = #tpu.dot_dimension_numbers<[1], [0], [0], [1], [0, 0, 1, 1], [], []>} : vector<16x8xf32>, vector<8x128xf32>, vector<16x128xf32> -> vector<16x128xf32>
    %c0_37 = arith.constant 0 : index
    %c0_38 = arith.constant 0 : index
    %c0_39 = arith.constant 0 : index
    %33 = vector.load %arg5[%c0_37, %c0_38, %c0_39] : memref<1x16x16xf32, #tpu.memory_space<vmem>>, vector<1x16x16xf32>
    %34 = vector.shape_cast %33 : vector<1x16x16xf32> to vector<16x16xf32>
    %cst_40 = arith.constant dense<0.000000e+00> : vector<16x128xf32>
    %35 = tpu.matmul %34, %22, %cst_40 {dimension_numbers = #tpu.dot_dimension_numbers<[1], [0], [0], [1], [0, 0, 1, 1], [], []>} : vector<16x16xf32>, vector<16x128xf32>, vector<16x128xf32> -> vector<16x128xf32>
    %36 = tpu.concatenate %22, %32, %35 in 1 : vector<16x128xf32>, vector<16x128xf32>, vector<16x128xf32> -> vector<16x384xf32>
    %cst_41 = arith.constant dense<0.000000e+00> : vector<16x128xf32>
    %37 = tpu.matmul %36, %24, %cst_41 {dimension_numbers = #tpu.dot_dimension_numbers<[1], [0], [0], [1], [0, 0, 1, 1], [], []>} : vector<16x384xf32>, vector<384x128xf32>, vector<16x128xf32> -> vector<16x128xf32>
    %38 = arith.addf %1, %29 : vector<8x128xf32>
    %cst_42 = arith.constant 0.000000e+00 : f32
    %39 = vector.broadcast %cst_42 : f32 to vector<8x128xf32>
    %40 = arith.maximumf %38, %39 : vector<8x128xf32>
    %c0_43 = arith.constant 0 : index
    %c0_44 = arith.constant 0 : index
    %c0_45 = arith.constant 0 : index
    %41 = vector.load %arg10[%c0_43, %c0_44, %c0_45] : memref<1x8x128xf32, #tpu.memory_space<vmem>>, vector<1x8x128xf32>
    %42 = vector.shape_cast %41 : vector<1x8x128xf32> to vector<8x128xf32>
    %43 = vector.shape_cast %40 : vector<8x128xf32> to vector<1x8x128xf32>
    tpu.vector_store %arg10[%c0_43, %c0_44, %c0_45], %43 {strides = array<i32>} : memref<1x8x128xf32, #tpu.memory_space<vmem>>, vector<1x8x128xf32>,
    %44 = arith.addf %3, %37 : vector<16x128xf32>
    %cst_46 = arith.constant 0.000000e+00 : f32
    %45 = vector.broadcast %cst_46 : f32 to vector<16x128xf32>
    %46 = arith.maximumf %44, %45 : vector<16x128xf32>
    %c0_47 = arith.constant 0 : index
    %c0_48 = arith.constant 0 : index
    %c0_49 = arith.constant 0 : index
    %47 = vector.load %arg11[%c0_47, %c0_48, %c0_49] : memref<1x16x128xf32, #tpu.memory_space<vmem>>, vector<1x16x128xf32>
    %48 = vector.shape_cast %47 : vector<1x16x128xf32> to vector<16x128xf32>
    %49 = vector.shape_cast %46 : vector<16x128xf32> to vector<1x16x128xf32>
    tpu.vector_store %arg11[%c0_47, %c0_48, %c0_49], %49 {strides = array<i32>} : memref<1x16x128xf32, #tpu.memory_space<vmem>>, vector<1x16x128xf32>,
    return
  }
  func.func @transform_0(%arg0: i32) -> (i32, i32, i32) {
    %c0_i32 = arith.constant 0 : i32
    %c0_i32_0 = arith.constant 0 : i32
    %c0_i32_1 = arith.constant 0 : i32
    return %arg0, %c0_i32, %c0_i32_0 : i32, i32, i32
  }
  func.func @transform_1(%arg0: i32) -> (i32, i32, i32) {
    %c0_i32 = arith.constant 0 : i32
    %c0_i32_0 = arith.constant 0 : i32
    %c0_i32_1 = arith.constant 0 : i32
    return %arg0, %c0_i32, %c0_i32_0 : i32, i32, i32
  }
  func.func @transform_2(%arg0: i32) -> (i32, i32, i32) {
    %c0_i32 = arith.constant 0 : i32
    %c0_i32_0 = arith.constant 0 : i32
    %c0_i32_1 = arith.constant 0 : i32
    return %arg0, %c0_i32, %c0_i32_0 : i32, i32, i32
  }
  func.func @transform_3(%arg0: i32) -> (i32, i32, i32) {
    %c0_i32 = arith.constant 0 : i32
    %c0_i32_0 = arith.constant 0 : i32
    %c0_i32_1 = arith.constant 0 : i32
    return %arg0, %c0_i32, %c0_i32_0 : i32, i32, i32
  }
  func.func @transform_4(%arg0: i32) -> (i32, i32, i32) {
    %c0_i32 = arith.constant 0 : i32
    %c0_i32_0 = arith.constant 0 : i32
    %c0_i32_1 = arith.constant 0 : i32
    return %arg0, %c0_i32, %c0_i32_0 : i32, i32, i32
  }
  func.func @transform_5(%arg0: i32) -> (i32, i32) {
    %c0_i32 = arith.constant 0 : i32
    %c0_i32_0 = arith.constant 0 : i32
    %c0_i32_1 = arith.constant 0 : i32
    return %c0_i32, %c0_i32_0 : i32, i32
  }
  func.func @transform_6(%arg0: i32) -> (i32, i32) {
    %c0_i32 = arith.constant 0 : i32
    %c0_i32_0 = arith.constant 0 : i32
    %c0_i32_1 = arith.constant 0 : i32
    return %c0_i32, %c0_i32_0 : i32, i32
  }
  func.func @transform_7(%arg0: i32) -> (i32, i32) {
    %c0_i32 = arith.constant 0 : i32
    %c0_i32_0 = arith.constant 0 : i32
    %c0_i32_1 = arith.constant 0 : i32
    return %c0_i32, %c0_i32_0 : i32, i32
  }
  func.func @transform_8(%arg0: i32) -> (i32, i32) {
    %c0_i32 = arith.constant 0 : i32
    %c0_i32_0 = arith.constant 0 : i32
    %c0_i32_1 = arith.constant 0 : i32
    return %c0_i32, %c0_i32_0 : i32, i32
  }
  func.func @transform_9(%arg0: i32) -> (i32, i32, i32) {
    %c0_i32 = arith.constant 0 : i32
    %c0_i32_0 = arith.constant 0 : i32
    %c0_i32_1 = arith.constant 0 : i32
    return %arg0, %c0_i32, %c0_i32_0 : i32, i32, i32
  }
  func.func @transform_10(%arg0: i32) -> (i32, i32, i32) {
    %c0_i32 = arith.constant 0 : i32
    %c0_i32_0 = arith.constant 0 : i32
    %c0_i32_1 = arith.constant 0 : i32
    return %arg0, %c0_i32, %c0_i32_0 : i32, i32, i32
  }
}

</mosaic_0001>

<bundles_post_ra>
// kernel: tpu_custom_call.1
= control target key start
LH: loop header
LB: loop body
LE: loop exit
PB: predicated region body
PF: predicated region fallthrough
CT: control target
= control target key end

     0   :  { %s2161_s0 = inlined_call_operand.vmem [shape: f32[4,8,128], index: 0, kind: input, shape index: {}]   ;;  %s2162_s1 = inlined_call_operand.vmem [shape: f32[4,16,128], index: 1, kind: input, shape index: {}]   ;;  %s2163_s2 = inlined_call_operand.hbm [shape: f32[4,8,16], index: 2, kind: input, shape index: {}]   ;;  %s2164_s3 = inlined_call_operand.vmem [shape: f32[4,16,8], index: 3, kind: input, shape index: {}]   ;;  %s2165_s4 = inlined_call_operand.hbm [shape: f32[4,16,16], index: 4, kind: input, shape index: {}]   ;;  %s2166_s5 = inlined_call_operand.hbm [shape: f32[256,128], index: 5, kind: input, shape index: {}]   ;;  %s2167_s6 = inlined_call_operand.hbm [shape: f32[384,128], index: 6, kind: input, shape index: {}]   ;;  %s2168_s7 = inlined_call_operand.hbm [shape: f32[256,128], index: 7, kind: input, shape index: {}]   ;;  %s2169_s8 = inlined_call_operand.hbm [shape: f32[384,128], index: 8, kind: input, shape index: {}]   ;;  %s2170_s9 = inlined_call_operand.hbm [shape: f32[4,8,128], index: 9, kind: output, shape index: {0}]   ;;  %s2171_s10 = inlined_call_operand.hbm [shape: f32[4,16,128], index: 10, kind: output, shape index: {1}]  }
   0x1   :  { %2179 = sst [smem:[#allocation28_spill]] %s2166_s5 }
   0x2   :  { %2180 = sst [smem:[#allocation29_spill]] %s2167_s6 }
   0x3   :  { %2181 = sst [smem:[#allocation30_spill]] %s2168_s7 }
   0x4   :  { %2182 = sst [smem:[#allocation31_spill]] %s2169_s8 }
   0x5   :  { %16 = vsyncpa [#allocation3], 0 }
   0x6   :  { %18 = vsyncpa [#allocation3 + $0x1], 0 }
   0x7   :  { %19 = vsyncpa [#allocation6], 0 }
   0x8   :  { %21 = vsyncpa [#allocation6 + $0x1], 0 }
   0x9   :  { %22 = vsyncpa [#allocation9], 0 }
   0xa   :  { %23 = vsyncpa [#allocation12], 0 }
   0xb   :  { %24 = vsyncpa [#allocation4], 0 }
   0xc   :  { %26 = vsyncpa [#allocation4 + $0x1], 0 }
   0xd   :  { %27 = vsyncpa [#allocation15], 0 }
   0xe   :  { %29 = vsyncpa [#allocation15 + $0x1], 0  ;;  %s1845_s13 = smov 0   ;;  %s1847_s14 = smov 0  }
   0xf   :  { %s1849_s15 = smov 0   ;;  %s1851_s16 = smov 0  }
  0x10 LB: > { %2183 = sst [smem:[#allocation23_spill]] %s1768_s13  ;;  %s1869_s20 = sadd.s32 4294967295, %s1780_s16   ;;  %s1780_s16 = sphi %s1851_s16, %s2203_s16   ;;  %s1776_s15 = sphi %s1849_s15, %s2205_s15   ;;  %s1772_s14 = sphi %s1847_s14, %s2207_s14   ;;  %s1768_s13 = sphi %s1845_s13, %s2206_s13  }
  0x11   : > { %2184 = sst [smem:[#allocation24_spill]] %s1776_s15  ;;  %p1339_p0 = scmp.ge.s32.totalorder %s1780_s16, 1 }
  0x12   : > { %s2185_s5 = sld [smem:[#allocation28_spill]]  ;;  %p108_p1 = scmp.eq.s32.totalorder %s1869_s20, 0 }
  0x13   : > { %p306_p2 = scmp.lt.s32.totalorder %s1780_s16, 5  ;;  %s1782_s22 = smov [#allocation7]  }
  0x14   : > { %s319_s23 = sshll.u32 %s1782_s22, 4  ;;  %s2187_s6 = sld [smem:[#allocation29_spill]]  ;;  %s320_s23 = int_to_ptr.vmem [resolvable:$true] %s319_s23 }
  0x15   : > { %p1874_p3 = pnand %p1339_p0, %p306_p2  ;;  %s2189_s7 = sld [smem:[#allocation30_spill]] }
  0x16   : > { %s1783_s11 = smov [#allocation8]   ;;  %s2172_s17 = smov 128  }
  0x17   : > { %p1409_p4 = pneg %p1874_p3  ;;  %s333_s12 = sshll.u32 %s1783_s11, 4  ;;  %s334_s12 = int_to_ptr.vmem [resolvable:$true] %s333_s12 }
  0x18   : > { %s317_s19 = sshll.u32 %s2185_s5, 4  ;;  %s2173_s18 = smov 8   ;;  %s318_s19 = int_to_ptr.hbm [resolvable:$true] %s317_s19 }
  0x19   : > { %p1885_p5 = pnand %p1409_p4, %p108_p1  ;;  %s2190_s8 = sld [smem:[#allocation31_spill]] }
  0x1a   : > { %s331_s26 = sshll.u32 %s2187_s6, 4  ;;  %s1786_s28 = smov [#allocation10]   ;;  %s332_s26 = int_to_ptr.hbm [resolvable:$true] %s331_s26 }
  0x1b   : > { %s345_s30 = sshll.u32 %s2189_s7, 4  ;;  %s1338_s29 = sadd.s32 4294967294, %s1780_s16   ;;  %s346_s30 = int_to_ptr.hbm [resolvable:$true] %s345_s30 }
  0x1c   : > { %1412 = dma.hbm_to_vmem [thread:$0]  (!%p1885_p5), %s318_s19, 4096, %s320_s23, [#allocation6], %s2172_s17, %s2172_s17, %s2173_s18  }
  0x1d   : > { %1415 = dma.hbm_to_vmem [thread:$0]  (!%p1885_p5), %s332_s26, 6144, %s334_s12, [#allocation9], %s2172_s17, %s2172_s17, %s2173_s18  }
  0x1e   : > { %s347_s19 = sshll.u32 %s1786_s28, 4  ;;  %s1787_s23 = smov [#allocation11]   ;;  %s348_s19 = int_to_ptr.vmem [resolvable:$true] %s347_s19 }
  0x1f   : > { %s359_s25 = sshll.u32 %s2190_s8, 4  ;;  %s361_s26 = sshll.u32 %s1787_s23, 4  ;;  %s360_s25 = int_to_ptr.hbm [resolvable:$true] %s359_s25  ;;  %s362_s26 = int_to_ptr.vmem [resolvable:$true] %s361_s26 }
  0x20   : > { %1418 = dma.hbm_to_vmem [thread:$0]  (!%p1885_p5), %s346_s30, 4096, %s348_s19, [#allocation9], %s2172_s17, %s2172_s17, %s2173_s18  }
  0x21   : > { %1421 = dma.hbm_to_vmem [thread:$0]  (!%p1885_p5), %s360_s25, 6144, %s362_s26, [#allocation12], %s2172_s17, %s2172_s17, %s2173_s18  }
  0x22   : > { %s1917_s11 = sadd.s32 1, %s1780_s16   ;;  %s94_s22 = sadd.s32 1, %s1776_s15 }
  0x23   : > { %2191 = sst [smem:[#allocation25_spill]] %s1917_s11  ;;  %s91_s12 = ssub.s32 %s1780_s16, %s1917_s11 }
  0x24   : > { %p92_p6 = scmp.eq.s32.totalorder %s91_s12, 0  ;;  %p101_p7 = scmp.ne.s32.totalorder %s1776_s15, %s1772_s14 }
  0x25   : > { %p102_p8 = scmp.eq.s32.totalorder %s1780_s16, 0  ;;  %p107_p9 = scmp.ne.s32.totalorder %s1772_s14, %s1768_s13 }
  0x26   : > { %s1928_s30 = scalar_select %p92_p6, %s1776_s15, %s94_s22  }
  0x27   : > { %p1930_p10 = por %p102_p8, %p101_p7  ;;  %p1936_p11 = por %p108_p1, %p107_p9 }
  0x28   : > { %2192 = sst [smem:[#allocation26_spill]] %s1928_s30  ;;  %p267_p12 = scmp.eq.s32.totalorder %s1869_s20, 3 }
  0x29   : > { %p273_p13 = scmp.eq.s32.totalorder %s1338_s29, 3  ;;  %p1440_p0 = scmp.lt.s32.totalorder %s1780_s16, 4 }
  0x2a   : > { %s1943_s25 = sand.u32 1, %s1776_s15   ;;  %p1945_p2 = por %p267_p12, %p101_p7 }
  0x2b   : > { %p1949_p4 = por %p273_p13, %p107_p9  ;;  %s1345_s23 = sshll.u32 %s1943_s25, 3 }
  0x2c   : > { %s1346_s26 = sshll.u32 %s1780_s16, 3  ;;  %s394_s17 = scalar_lea.vmem [#allocation2], %s1345_s23 }
  0x2d   : > { %s2196_s19 = scalar_select %p1949_p4, 1, 0 }
  0x2e   : > { %s398_s29 = scalar_lea.hbm %s2163_s2, %s1346_s26  ;;  %s402_s18 = sshll.u32 %s394_s17, 4  ;;  %s403_s18 = int_to_ptr.vmem [resolvable:$true] %s402_s18 }
  0x2f   : > { %2197 = sst [smem:[#allocation27_spill]] %s2196_s19  ;;  %s400_s5 = sshll.u32 %s398_s29, 4  ;;  %s401_s5 = int_to_ptr.hbm [resolvable:$true] %s400_s5 }
  0x30   : > { %p1960_p5 = pnand %p1440_p0, %p1930_p10  ;;  %s1347_s7 = sshll.u32 %s1943_s25, 4 }
  0x31   : > { %s417_s8 = sand.u32 1, %s1780_s16   ;;  %s391_s30 = scalar_lea.sflag [#allocation3], %s1943_s25 }
  0x32   : > { %s1606_s15 = sshra.s32 %s401_s5, 4  ;;  %p1610_p7 = pneg %p1960_p5  ;;  %s1607_s15 = int_to_ptr.hbm [resolvable:$true] %s1606_s15 }
  0x33   : > { %s1608_s11 = scalar_lea.hbm %s1607_s15, 8  ;;  %s1613_s23 = scalar_lea.hbm %s2163_s2, 32 }
  0x34   : > { %p1609_p6 = scmp.ne.s32.totalorder %s1607_s15, %s1608_s11  ;;  %p1614_p10 = scmp.lt.s32.totalorder %s1607_s15, %s2163_s2 }
  0x35   : > { %p1615_p12 = scmp.lt.s32.totalorder %s1613_s23, %s1608_s11 }
  0x36   : > { %p1611_p8 = pnand %p1610_p7, %p1609_p6 }
  0x37   : > { %p1616_p13 = por %p1615_p12, %p1614_p10 }
  0x38   : > { %p1612_p9 = pneg %p1611_p8 }
  0x3a   : > { %p1617_p0 = pnand %p1616_p13, %p1612_p9 }
  0x3c   : > { %1620 = shalt.err (!%p1617_p0)
}
  0x3d   : > { %1425 = dma.hbm_to_vmem [thread:$0]  (!%p1960_p5), %s401_s5, 128, %s403_s18, %s391_s30  }
  0x3e   : > { %s421_s25 = scalar_lea.vmem [#allocation5], %s1347_s7  ;;  %s1381_s29 = sshll.u32 %s1780_s16, 4 }
  0x3f   : > { %s429_s22 = sshll.u32 %s421_s25, 4  ;;  %s426_s27 = scalar_lea.hbm %s2165_s4, %s1381_s29  ;;  %s430_s22 = int_to_ptr.vmem [resolvable:$true] %s429_s22 }
  0x40   : > { %s427_s13 = sshll.u32 %s426_s27, 4  ;;  %s418_s15 = scalar_lea.sflag [#allocation6], %s417_s8  ;;  %s428_s13 = int_to_ptr.hbm [resolvable:$true] %s427_s13 }
  0x41   : > { %s1636_s11 = sshra.s32 %s428_s13, 4  ;;  %s1643_s18 = scalar_lea.hbm %s2165_s4, 64  ;;  %s1637_s11 = int_to_ptr.hbm [resolvable:$true] %s1636_s11 }
  0x42   : > { %s1638_s23 = scalar_lea.hbm %s1637_s11, 16  ;;  %p1644_p10 = scmp.lt.s32.totalorder %s1637_s11, %s2165_s4 }
  0x43   : > { %p1639_p6 = scmp.ne.s32.totalorder %s1637_s11, %s1638_s23  ;;  %p1645_p12 = scmp.lt.s32.totalorder %s1643_s18, %s1638_s23 }
  0x45   : > { %p1641_p8 = pnand %p1639_p6, %p1610_p7  ;;  %p1646_p13 = por %p1645_p12, %p1644_p10 }
  0x47   : > { %p1642_p9 = pneg %p1641_p8 }
  0x49   : > { %p1647_p0 = pnand %p1646_p13, %p1642_p9 }
  0x4b   : > { %1650 = shalt.err (!%p1647_p0)
}
  0x4c   : > { %s2199_s8 = smov 8   ;;  %s2200_s19 = smov 128  }
  0x4d   : > { %1428 = dma.hbm_to_vmem [thread:$0]  (!%p1960_p5), %s428_s13, 256, %s430_s22, %s418_s15, %s2200_s19, %s2200_s19, %s2199_s8  }
  0x4e   : > { %441 = sbr.rel (%p1874_p3) target bundleno = 700 (0x2bc), region = 56  ;;  %s2001_s12 = sand.u32 (!%p1874_p3), 1, %s1772_s14  }
  0x4f   : > { %s1351_s25 = sshll.u32 (!%p1874_p3), %s2001_s12, 3  ;;  %s444_s29 = scalar_lea.sflag (!%p1874_p3), [#allocation3], %s2001_s12 }
  0x50   : > { %s447_s17 = scalar_lea.vmem (!%p1874_p3), [#allocation2], %s1351_s25 }
  0x53   : > { %1739 = dma.done.wait (%p1936_p11), %s444_s29, 128  }
  0x54   : > { %1741 = vsyncadd (%p1936_p11), %s444_s29, 4294967168  ;;  %s453_s6 = sand.u32 1, %s1869_s20   ;;  %s1352_s13 = sshll.u32 %s2001_s12, 4 }
  0x55   : > { %s454_s21 = scalar_lea.sflag [#allocation6], %s453_s6  ;;  %s2015_s22 = scalar_lea.vmem [#allocation5], %s1352_s13 }
  0x56   : > { %1743 = dma.done.wait (%p1936_p11), %s454_s21, 256  }
  0x57   : > { %1745 = vsyncadd (%p1936_p11), %s454_s21, 4294967040 }
  0x58   : > { %1747 = dma.done.wait (%p108_p1), [#allocation6], 4096  }
  0x59   : > { %1749 = vsyncadd (%p108_p1), [#allocation6], 4294963200 }
  0x5a   : > { %1751 = dma.done.wait (%p108_p1), [#allocation9], 10240  }
  0x5b   : > { %1753 = vsyncadd (%p108_p1), [#allocation9], 4294957056 }
  0x5c   : > { %1755 = dma.done.wait (%p108_p1), [#allocation12], 6144  }
  0x5d   : > { %1757 = vsyncadd (%p108_p1), [#allocation12], 4294961152  ;;  %p539_p3 = scmp.lt.s32.totalorder %s1869_s20, 3  ;;  %vm703_vm0 = vcmask 64512   ;;  %v2052_v3 = vld [vmem:[%s447_s17] sm:$0xff]  ;;  %vm637_vm1 = vcmask 130048  }
  0x5e   : > { %v571_v5 = vld [vmem:[#allocation7 + $0x78] sm:$0xff]  ;;  %v570_v6 = vld [vmem:[#allocation7 + $0x70] sm:$0xff]  ;;  %v569_v7 = vld [vmem:[#allocation7 + $0x68] sm:$0xff]  ;;  %s1376_s29 = sshll.u32 %s1869_s20, 3 }
  0x5f   : > { %s540_s24 = scalar_select %p539_p3, %s1869_s20, 3  ;;  %661 = vmatpush.msra.mxu1 %v571_v5  ;;  %v568_v8 = vld [vmem:[#allocation7 + $0x60] sm:$0xff]  ;;  %v587_v9 = vld [vmem:[#allocation7 + $0xf8] sm:$0xff]  ;;  %v586_v12 = vld [vmem:[#allocation7 + $0xf0] sm:$0xff] }
  0x60   : > { %v603_v11 = vld [vmem:[#allocation8 + $0x78] sm:$0xff]  ;;  %681 = vmatpush.msra.mxu2 %v587_v9  ;;  %v602_v14 = vld [vmem:[#allocation8 + $0x70] sm:$0xff]  ;;  %v585_v16 = vld [vmem:[#allocation7 + $0xe8] sm:$0xff]  ;;  %s1116_s21 = scalar_lea.hbm %s2170_s9, %s1376_s29 }
  0x61   : > { %s1382_s27 = sshll.u32 %s540_s24, 4  ;;  %s1359_s15 = sshll.u32 %s540_s24, 3  ;;  %662 = vmatpush.msra.mxu1 %v570_v6  ;;  %v567_v13 = vld [vmem:[#allocation7 + $0x58] sm:$0xff]  ;;  %v2066_v15 = vld [vmem:[%s2015_s22] sm:$0xff]  ;;  %v601_v18 = vld [vmem:[#allocation8 + $0x68] sm:$0xff] }
  0x62   : > { %s547_s5 = scalar_lea.vmem %s2162_s1, %s1382_s27  ;;  %s542_s30 = scalar_lea.vmem %s2161_s0, %s1359_s15  ;;  %v566_v17 = vld [vmem:[#allocation7 + $0x50] sm:$0xff]  ;;  %682 = vmatpush.msra.mxu2 %v586_v12  ;;  %v584_v19 = vld [vmem:[#allocation7 + $0xe0] sm:$0xff]  ;;  %v619_v20 = vld [vmem:[#allocation8 + $0xf8] sm:$0xff] }
  0x63   : > { %s552_s19 = scalar_lea.vmem %s2164_s3, %s1382_s27  ;;  %v2044_v0 = vld [vmem:[%s547_s5 + $0x8] sm:$0xff]  ;;  %v2046_v1 = vld [vmem:[%s547_s5] sm:$0xff]  ;;  %663 = vmatpush.msra.mxu1 %v569_v7  ;;  %v565_v21 = vld [vmem:[#allocation7 + $0x48] sm:$0xff]  ;;  %s1120_s27 = sshll.u32 %s1116_s21, 4  ;;  %s1121_s27 = int_to_ptr.hbm [resolvable:$true] %s1120_s27 }
  0x64   : > { %v2048_v2 = vld [vmem:[%s542_s30] sm:$0xff]  ;;  %655 = vmatpush.msra.mxu0 %v2044_v0  ;;  %v2063_v10 = vld [vmem:[%s552_s19 + $0x8] sm:$0xff]  ;;  %683 = vmatpush.msra.mxu2 %v585_v16  ;;  %v600_v22 = vld [vmem:[#allocation8 + $0x60] sm:$0xff]  ;;  %s1101_s15 = scalar_lea.sflag [#allocation4], %s2001_s12  ;;  %s1680_s11 = sshra.s32 %s1121_s27, 4  ;;  %s1681_s11 = int_to_ptr.hbm [resolvable:$true] %s1680_s11 }
  0x65   : > { %725 = vmatpush.msra.mxu3 %v2048_v2  ;;  %v2054_v4 = vld [vmem:[%s552_s19] sm:$0xff]  ;;  %664 = vmatpush.msra.mxu1 %v568_v8  ;;  %v583_v23 = vld [vmem:[#allocation7 + $0xd8] sm:$0xff]  ;;  %v564_v25 = vld [vmem:[#allocation7 + $0x40] sm:$0xff]  ;;  %s1682_s23 = scalar_lea.hbm %s1681_s11, 8  ;;  %p1687_p7 = scmp.lt.s32.totalorder %s1681_s11, %s2170_s9 }
  0x66   : > { %1365 = vmatmul.msk.f32.vlgmr.msra.gmra.mxu3 %vm703_vm0, %v2054_v4  ;;  %656 = vmatpush.msra.mxu0 %v2046_v1  ;;  %v618_v24 = vld [vmem:[#allocation8 + $0xf0] sm:$0xff]  ;;  %v599_v26 = vld [vmem:[#allocation8 + $0x58] sm:$0xff]  ;;  %v617_v28 = vld [vmem:[#allocation8 + $0xe8] sm:$0xff]  ;;  %p1683_p1 = scmp.ne.s32.totalorder %s1681_s11, %s1682_s23 }
  0x67   : > { %1364 = vmatmul.msk.f32.vlgmr.msra.gmra.mxu0 %vm637_vm1, %v2052_v3  ;;  %764 = vmatpush.msrb.mxu3 %v603_v11  ;;  %v582_v27 = vld [vmem:[#allocation7 + $0xd0] sm:$0xff]  ;;  %v563_v29 = vld [vmem:[#allocation7 + $0x38] sm:$0xff]  ;;  %v581_v32 = vld [vmem:[#allocation7 + $0xc8] sm:$0xff] }
  0x68   : > { %755 = vmatpush.msrb.mxu0 %v2044_v0  ;;  %665 = vmatpush.msra.mxu1 %v567_v13  ;;  %v598_v30 = vld [vmem:[#allocation8 + $0x50] sm:$0xff]  ;;  %v2073_v31 = vld [vmem:[%s2015_s22 + $0x8] sm:$0xff]  ;;  %v616_v35 = vld [vmem:[#allocation8 + $0xe0] sm:$0xff]  ;;  %s531_s22 = scalar_lea.vmem [#allocation13], %s1351_s25  ;;  %p1684_p11 = pnand %p1683_p1, %p1945_p2 }
  0x69   : > { %765 = vmatpush.msrb.mxu3 %v602_v14  ;;  %684 = vmatpush.msra.mxu2 %v584_v19  ;;  %v562_v33 = vld [vmem:[#allocation7 + $0x30] sm:$0xff]  ;;  %v597_v34 = vld [vmem:[#allocation8 + $0x48] sm:$0xff]  ;;  %v580_v36 = vld [vmem:[#allocation7 + $0xc0] sm:$0xff]  ;;  %s1118_s24 = sshll.u32 %s531_s22, 4  ;;  %s1686_s25 = scalar_lea.hbm %s2170_s9, 32  ;;  %s1119_s24 = int_to_ptr.vmem [resolvable:$true] %s1118_s24 }
  0x6a   : > { %756 = vmatpush.msrb.mxu0 %v2046_v1  ;;  %666 = vmatpush.msra.mxu1 %v566_v17  ;;  %v561_v37 = vld [vmem:[#allocation7 + $0x28] sm:$0xff]  ;;  %v596_v38 = vld [vmem:[#allocation8 + $0x40] sm:$0xff]  ;;  %v615_v39 = vld [vmem:[#allocation8 + $0xd8] sm:$0xff]  ;;  %p1685_p5 = pneg %p1684_p11  ;;  %p1688_p6 = scmp.lt.s32.totalorder %s1686_s25, %s1682_s23 }
  0x6b   : > { %766 = vmatpush.msrb.mxu3 %v601_v18  ;;  %685 = vmatpush.msra.mxu2 %v583_v23  ;;  %v579_v40 = vld [vmem:[#allocation7 + $0xb8] sm:$0xff]  ;;  %v560_v41 = vld [vmem:[#allocation7 + $0x20] sm:$0xff]  ;;  %v614_v43 = vld [vmem:[#allocation8 + $0xd0] sm:$0xff] }
  0x6c   : > { %787 = vmatpush.msra.mxu0 %v619_v20  ;;  %667 = vmatpush.msra.mxu1 %v565_v21  ;;  %v595_v42 = vld [vmem:[#allocation8 + $0x38] sm:$0xff]  ;;  %v578_v44 = vld [vmem:[#allocation7 + $0xb0] sm:$0xff]  ;;  %v613_v47 = vld [vmem:[#allocation8 + $0xc8] sm:$0xff]  ;;  %p1689_p8 = por %p1688_p6, %p1687_p7 }
  0x6d   : > { %767 = vmatpush.msrb.mxu3 %v600_v22  ;;  %686 = vmatpush.msra.mxu2 %v582_v27  ;;  %v559_v45 = vld [vmem:[#allocation7 + $0x18] sm:$0xff]  ;;  %v594_v46 = vld [vmem:[#allocation8 + $0x30] sm:$0xff]  ;;  %v577_v48 = vld [vmem:[#allocation7 + $0xa8] sm:$0xff] }
  0x6e   : > { %1366 = vmatmul.msk.f32.gmra.mxu3 %vm703_vm0, %v2063_v10  ;;  %788 = vmatpush.msra.mxu0 %v618_v24  ;;  %v558_v49 = vld [vmem:[#allocation7 + $0x10] sm:$0xff]  ;;  %v593_v50 = vld [vmem:[#allocation8 + $0x28] sm:$0xff]  ;;  %v612_v51 = vld [vmem:[#allocation8 + $0xc0] sm:$0xff]  ;;  %p1690_p9 = pnand %p1689_p8, %p1685_p5 }
  0x6f   : > { %1367 = vmatmul.msk.f32.vlgmr.msrb.gmra.mxu0 %vm637_vm1, %v2066_v15  ;;  %668 = vmatpush.msra.mxu1 %v564_v25  ;;  %v576_v52 = vld [vmem:[#allocation7 + $0xa0] sm:$0xff]  ;;  %v557_v53 = vld [vmem:[#allocation7 + $0x8] sm:$0xff]  ;;  %v611_v55 = vld [vmem:[#allocation8 + $0xb8] sm:$0xff] }
  0x70   : > { %768 = vmatpush.msrb.mxu3 %v599_v26  ;;  %789 = vmatpush.msra.mxu0 %v617_v28  ;;  %v592_v54 = vld [vmem:[#allocation8 + $0x20] sm:$0xff]  ;;  %v575_v56 = vld [vmem:[#allocation7 + $0x98] sm:$0xff]  ;;  %v610_v60 = vld [vmem:[#allocation8 + $0xb0] sm:$0xff] }
  0x71   : > { %669 = vmatpush.msra.mxu1 %v563_v29  ;;  %687 = vmatpush.msra.mxu2 %v581_v32  ;;  %v556_v57 = vld [vmem:[#allocation7] sm:$0xff]  ;;  %v591_v58 = vld [vmem:[#allocation8 + $0x18] sm:$0xff]  ;;  %v574_v61 = vld [vmem:[#allocation7 + $0x90] sm:$0xff] }
  0x72   : > { %769 = vmatpush.msrb.mxu3 %v598_v30  ;;  %790 = vmatpush.msra.mxu0 %v616_v35  ;;  %v635_v59 = vld [vmem:[#allocation8 + $0x178] sm:$0xff]  ;;  %v590_v62 = vld [vmem:[#allocation8 + $0x10] sm:$0xff]  ;;  %v609_v5 = vld [vmem:[#allocation8 + $0xa8] sm:$0xff] }
  0x73   : > { %670 = vmatpush.msra.mxu1 %v562_v33  ;;  %688 = vmatpush.msra.mxu2 %v580_v36  ;;  %v634_v63 = vld [vmem:[#allocation8 + $0x170] sm:$0xff]  ;;  %v573_v6 = vld [vmem:[#allocation7 + $0x88] sm:$0xff]  ;;  %v608_v9 = vld [vmem:[#allocation8 + $0xa0] sm:$0xff] }
  0x74   : > { %770 = vmatpush.msrb.mxu3 %v597_v34  ;;  %791 = vmatpush.msra.mxu0 %v615_v39  ;;  %v589_v7 = vld [vmem:[#allocation8 + $0x8] sm:$0xff]  ;;  %v632_v11 = vld [vmem:[#allocation8 + $0x160] sm:$0xff]  ;;  %v631_v12 = vld [vmem:[#allocation8 + $0x158] sm:$0xff] }
  0x75   : > { %671 = vmatpush.msra.mxu1 %v561_v37  ;;  %689 = vmatpush.msra.mxu2 %v579_v40  ;;  %v633_v8 = vld [vmem:[#allocation8 + $0x168] sm:$0xff]  ;;  %v630_v13 = vld [vmem:[#allocation8 + $0x150] sm:$0xff]  ;;  %v628_v16 = vld [vmem:[#allocation8 + $0x140] sm:$0xff] }
  0x76   : > { %771 = vmatpush.msrb.mxu3 %v596_v38  ;;  %792 = vmatpush.msra.mxu0 %v614_v43  ;;  %v629_v14 = vld [vmem:[#allocation8 + $0x148] sm:$0xff]  ;;  %v627_v17 = vld [vmem:[#allocation8 + $0x138] sm:$0xff]  ;;  %v626_v18 = vld [vmem:[#allocation8 + $0x130] sm:$0xff] }
  0x77   : > { %1368 = vmatmul.msk.f32.gmra.mxu0 %vm637_vm1, %v2073_v31  ;;  %672 = vmatpush.msra.mxu1 %v560_v41  ;;  %v625_v19 = vld [vmem:[#allocation8 + $0x128] sm:$0xff]  ;;  %v572_v20 = vld [vmem:[#allocation7 + $0x80] sm:$0xff]  ;;  %v607_v22 = vld [vmem:[#allocation8 + $0x98] sm:$0xff] }
  0x78   : > { %772 = vmatpush.msrb.mxu3 %v595_v42  ;;  %690 = vmatpush.msra.mxu2 %v578_v44  ;;  %v588_v21 = vld [vmem:[#allocation8] sm:$0xff]  ;;  %v606_v24 = vld [vmem:[#allocation8 + $0x90] sm:$0xff]  ;;  %v623_v25 = vld [vmem:[#allocation8 + $0x118] sm:$0xff] }
  0x79   : > { %673 = vmatpush.msra.mxu1 %v559_v45  ;;  %793 = vmatpush.msra.mxu0 %v613_v47  ;;  %v624_v23 = vld [vmem:[#allocation8 + $0x120] sm:$0xff]  ;;  %v605_v26 = vld [vmem:[#allocation8 + $0x88] sm:$0xff]  ;;  %v622_v27 = vld [vmem:[#allocation8 + $0x110] sm:$0xff] }
  0x7a   : > { %773 = vmatpush.msrb.mxu3 %v594_v46  ;;  %691 = vmatpush.msra.mxu2 %v577_v48  ;;  %v604_v28 = vld [vmem:[#allocation8 + $0x80] sm:$0xff]  ;;  %v621_v29 = vld [vmem:[#allocation8 + $0x108] sm:$0xff]  ;;  %v883_v44 = vld [vmem:[#allocation11 + $0x78] sm:$0xff] }
  0x7b   : > { %674 = vmatpush.msra.mxu1 %v558_v49  ;;  %794 = vmatpush.msra.mxu0 %v612_v51  ;;  %v620_v30 = vld [vmem:[#allocation8 + $0x100] sm:$0xff]  ;;  %v882_v47 = vld [vmem:[#allocation11 + $0x70] sm:$0xff] }
  0x7c   : > { %774 = vmatpush.msrb.mxu3 %v593_v50  ;;  %692 = vmatpush.msra.mxu2 %v576_v52  ;;  %v881_v50 = vld [vmem:[#allocation11 + $0x68] sm:$0xff]  ;;  %v880_v52 = vld [vmem:[#allocation11 + $0x60] sm:$0xff] }
  0x7d   : > { %675 = vmatpush.msra.mxu1 %v557_v53  ;;  %795 = vmatpush.msra.mxu0 %v611_v55  ;;  %v879_v55 = vld [vmem:[#allocation11 + $0x58] sm:$0xff] }
  0x7e   : > { %775 = vmatpush.msrb.mxu3 %v592_v54  ;;  %693 = vmatpush.msra.mxu2 %v575_v56 }
  0x7f   : > { %676 = vmatpush.msra.mxu1 %v556_v57  ;;  %796 = vmatpush.msra.mxu0 %v610_v60  ;;  %v850_v60 = vld [vmem:[#allocation10 + $0x70] sm:$0xff] }
  0x80   : > { %776 = vmatpush.msrb.mxu3 %v591_v58  ;;  %694 = vmatpush.msra.mxu2 %v574_v61  ;;  %v851_v58 = vld [vmem:[#allocation10 + $0x78] sm:$0xff]  ;;  %v876_v61 = vld [vmem:[#allocation11 + $0x40] sm:$0xff] }
  0x81   : > { %810 = vmatpush.msrb.mxu1 %v635_v59  ;;  %797 = vmatpush.msra.mxu0 %v609_v5  ;;  %v877_v59 = vld [vmem:[#allocation11 + $0x48] sm:$0xff]  ;;  %v874_v5 = vld [vmem:[#allocation11 + $0x30] sm:$0xff] }
  0x82   : > { %777 = vmatpush.msrb.mxu3 %v590_v62  ;;  %695 = vmatpush.msra.mxu2 %v573_v6  ;;  %v849_v62 = vld [vmem:[#allocation10 + $0x68] sm:$0xff]  ;;  %v847_v6 = vld [vmem:[#allocation10 + $0x58] sm:$0xff] }
  0x83   : > { %811 = vmatpush.msrb.mxu1 %v634_v63  ;;  %798 = vmatpush.msra.mxu0 %v608_v9  ;;  %v848_v63 = vld [vmem:[#allocation10 + $0x60] sm:$0xff] }
  0x84   : > { %778 = vmatpush.msrb.mxu3 %v589_v7  ;;  %677 = vmatmul.f32.vlgmr.msra.gmra.mxu1 %v2048_v2  ;;  %v873_v7 = vld [vmem:[#allocation11 + $0x28] sm:$0xff]  ;;  %v872_v9 = vld [vmem:[#allocation11 + $0x20] sm:$0xff] }
  0x85   : > { %812 = vmatpush.msrb.mxu1 %v633_v8  ;;  %696 = vmatpush.msra.mxu2 %v572_v20  ;;  %v846_v8 = vld [vmem:[#allocation10 + $0x50] sm:$0xff] }
  0x86   : > { %779 = vmatpush.msrb.mxu3 %v588_v21  ;;  %799 = vmatpush.msra.mxu0 %v607_v22  ;;  %v898_v20 = vld [vmem:[#allocation11 + $0xf0] sm:$0xff]  ;;  %v841_v21 = vld [vmem:[#allocation10 + $0x28] sm:$0xff] }
  0x87   : > { %813 = vmatpush.msrb.mxu1 %v632_v11  ;;  %780 = vmatmul.f32.vlgmr.msrb.gmra.mxu3 %v2046_v1  ;;  %v871_v11 = vld [vmem:[#allocation11 + $0x18] sm:$0xff]  ;;  %v897_v22 = vld [vmem:[#allocation11 + $0xe8] sm:$0xff] }
  0x88   : > { %800 = vmatpush.msra.mxu0 %v606_v24  ;;  %v840_v24 = vld [vmem:[#allocation10 + $0x20] sm:$0xff] }
  0x89   : > { %814 = vmatpush.msrb.mxu1 %v631_v12  ;;  %v844_v12 = vld [vmem:[#allocation10 + $0x40] sm:$0xff] }
  0x8a   : > { %801 = vmatpush.msra.mxu0 %v605_v26  ;;  %v896_v26 = vld [vmem:[#allocation11 + $0xe0] sm:$0xff] }
  0x8b   : > { %815 = vmatpush.msrb.mxu1 %v630_v13  ;;  %v870_v13 = vld [vmem:[#allocation11 + $0x10] sm:$0xff] }
  0x8c   : > { %802 = vmatpush.msra.mxu0 %v604_v28  ;;  %v865_v28 = vld [vmem:[#allocation10 + $0xe8] sm:$0xff] }
  0x8d   : > { %816 = vmatpush.msrb.mxu1 %v629_v14  ;;  %v843_v14 = vld [vmem:[#allocation10 + $0x38] sm:$0xff] }
  0x8f   : > { %817 = vmatpush.msrb.mxu1 %v628_v16  ;;  %783 = vmatmul.f32.gmra.mxu3 %v2044_v0  ;;  %v869_v16 = vld [vmem:[#allocation11 + $0x8] sm:$0xff] }
  0x91   : > { %818 = vmatpush.msrb.mxu1 %v627_v17  ;;  %v842_v17 = vld [vmem:[#allocation10 + $0x30] sm:$0xff] }
  0x93   : > { %819 = vmatpush.msrb.mxu1 %v626_v18  ;;  %v868_v18 = vld [vmem:[#allocation11] sm:$0xff] }
  0x95   : > { %820 = vmatpush.msrb.mxu1 %v625_v19  ;;  %v899_v19 = vld [vmem:[#allocation11 + $0xf8] sm:$0xff] }
  0x97   : > { %821 = vmatpush.msrb.mxu1 %v624_v23  ;;  %v867_v23 = vld [vmem:[#allocation10 + $0xf8] sm:$0xff] }
  0x98   : > { %956 = vmatpush.msrb.mxu2 %v867_v23 }
  0x99   : > { %822 = vmatpush.msrb.mxu1 %v623_v25  ;;  %v866_v25 = vld [vmem:[#allocation10 + $0xf0] sm:$0xff] }
  0x9a   : > { %957 = vmatpush.msrb.mxu2 %v866_v25 }
  0x9b   : > { %823 = vmatpush.msrb.mxu1 %v622_v27  ;;  %v839_v27 = vld [vmem:[#allocation10 + $0x18] sm:$0xff] }
  0x9c   : > { %958 = vmatpush.msrb.mxu2 %v865_v28 }
  0x9d   : > { %824 = vmatpush.msrb.mxu1 %v621_v29  ;;  %v895_v29 = vld [vmem:[#allocation11 + $0xd8] sm:$0xff] }
  0x9f   : > { %825 = vmatpush.msrb.mxu1 %v620_v30  ;;  %v838_v30 = vld [vmem:[#allocation10 + $0x10] sm:$0xff] }
  0xa1   : > { %1045 = vmatpush.msra.mxu1 %v899_v19 }
  0xa3   : > { %1046 = vmatpush.msra.mxu1 %v898_v20 }
  0xa5   : > { %1047 = vmatpush.msra.mxu1 %v897_v22 }
  0xa7   : > { %1048 = vmatpush.msra.mxu1 %v896_v26 }
  0xa9   : > { %1049 = vmatpush.msra.mxu1 %v895_v29 }
  0xe4   : > { %v658_v32 = vpop.f32.mrf.mxu0 }
  0xe5   : > { %697 = vmatmul.f32.vlgmr.msra.gmra.mxu2 %v658_v32  ;;  %v864_v32 = vld [vmem:[#allocation10 + $0xe0] sm:$0xff] }
  0xe6   : > { %959 = vmatpush.msrb.mxu2 %v864_v32 }
  0xe9   : > { %v727_v33 = vpop.f32.mrf.mxu3 }
  0xea   : > { %803 = vmatmul.f32.vlgmr.msra.gmra.mxu0 %v727_v33  ;;  %v894_v33 = vld [vmem:[#allocation11 + $0xd0] sm:$0xff] }
  0xeb   : > { %1050 = vmatpush.msra.mxu1 %v894_v33 }
  0xec   : > { %v758_v34 = vpop.f32.mrf.mxu0 }
  0xed   : > { %826 = vmatmul.f32.vlgmr.msrb.gmra.mxu1 %v758_v34  ;;  %v837_v34 = vld [vmem:[#allocation10 + $0x8] sm:$0xff] }
  0xf1   : > { %v730_v35 = vpop.f32.mrf.mxu3 }
  0xf2   : > { %806 = vmatmul.f32.gmra.mxu0 %v730_v35  ;;  %v863_v35 = vld [vmem:[#allocation10 + $0xd8] sm:$0xff] }
  0xf3   : > { %960 = vmatpush.msrb.mxu2 %v863_v35 }
  0xf4   : > { %v761_v36 = vpop.f32.mrf.mxu0 }
  0xf5   : > { %829 = vmatmul.f32.gmra.mxu1 %v761_v36  ;;  %v893_v36 = vld [vmem:[#allocation11 + $0xc8] sm:$0xff] }
  0xf6   : > { %1051 = vmatpush.msra.mxu1 %v893_v36 }
 0x101   : > { %v678_v37 = vpop.f32.mrf.mxu1 }
 0x10a   : > { %v781_v38 = vpop.f32.mrf.mxu3 }
 0x112   : > { %v784_v45 = vpop.f32.mrf.mxu3 }
 0x167   : > { %v804_v39 = vpop.f32.mrf.mxu0 }
 0x168   : > { %v698_v40 = vpop.f32.mrf.mxu2  ;;  %v805_v48 = vadd.f32 %v804_v39, %v781_v38  ;;  %v862_v38 = vld [vmem:[#allocation10 + $0xd0] sm:$0xff]  ;;  %v892_v39 = vld [vmem:[#allocation11 + $0xc0] sm:$0xff] }
 0x169   : > { %v2080_v41 = vadd.f32 %v698_v40, %v678_v37  ;;  %v836_v37 = vld [vmem:[#allocation10] sm:$0xff]  ;;  %v861_v40 = vld [vmem:[#allocation10 + $0xc8] sm:$0xff]  ;;  %961 = vmatpush.msrb.mxu2 %v862_v38  ;;  %1052 = vmatpush.msra.mxu1 %v892_v39 }
 0x16a   : > { %v827_v42 = vpop.f32.mrf.mxu1 }
 0x16b   : > { %v833_v43 = vmax.f32 %v2080_v41, 0.0  ;;  %v828_v53 = vadd.f32 %v827_v42, %v805_v48  ;;  %v891_v42 = vld [vmem:[#allocation11 + $0xb8] sm:$0xff]  ;;  %962 = vmatpush.msrb.mxu2 %v861_v40  ;;  %v886_v48 = vld [vmem:[#allocation11 + $0x90] sm:$0xff]  ;;  %v885_v41 = vld [vmem:[#allocation11 + $0x88] sm:$0xff] }
 0x16c   : > { %1053 = vmatpush.msra.mxu1 %v891_v42 }
 0x16d   : > { %991 = vmatpush.msrb.mxu0 %v833_v43  ;;  %v2091_v57 = vmax.f32 %v828_v53, 0.0  ;;  %v855_v53 = vld [vmem:[#allocation10 + $0x98] sm:$0xff] }
 0x16e   : > { %1370 = vmatmul.msk.f32.vlgmr.msrb.gmra.mxu0 %vm703_vm0, %v2054_v4  ;;  %v878_v4 = vld [vmem:[#allocation11 + $0x50] sm:$0xff] }
 0x16f   : > { %v807_v46 = vpop.f32.mrf.mxu0  ;;  %1022 = vmatpush.msra.mxu0 %v883_v44  ;;  %v890_v44 = vld [vmem:[#allocation11 + $0xb0] sm:$0xff] }
 0x170   : > { %v808_v49 = vadd.f32 %v807_v46, %v784_v45  ;;  %v889_v45 = vld [vmem:[#allocation11 + $0xa8] sm:$0xff]  ;;  %1054 = vmatpush.msra.mxu1 %v890_v44  ;;  %v888_v46 = vld [vmem:[#allocation11 + $0xa0] sm:$0xff] }
 0x171   : > { %1023 = vmatpush.msra.mxu0 %v882_v47  ;;  %v887_v47 = vld [vmem:[#allocation11 + $0x98] sm:$0xff] }
 0x172   : > { %v830_v51 = vpop.f32.mrf.mxu1  ;;  %1055 = vmatpush.msra.mxu1 %v889_v45 }
 0x173   : > { %v831_v54 = vadd.f32 %v830_v51, %v808_v49  ;;  %1024 = vmatpush.msra.mxu0 %v881_v50  ;;  %v860_v49 = vld [vmem:[#allocation10 + $0xc0] sm:$0xff]  ;;  %v859_v50 = vld [vmem:[#allocation10 + $0xb8] sm:$0xff]  ;;  %v858_v51 = vld [vmem:[#allocation10 + $0xb0] sm:$0xff] }
 0x174   : > { %1056 = vmatpush.msra.mxu1 %v888_v46  ;;  %963 = vmatpush.msrb.mxu2 %v860_v49 }
 0x175   : > { %v2087_v56 = vmax.f32 %v831_v54, 0.0  ;;  %1025 = vmatpush.msra.mxu0 %v880_v52  ;;  %v857_v52 = vld [vmem:[#allocation10 + $0xa8] sm:$0xff]  ;;  %v854_v54 = vld [vmem:[#allocation10 + $0x90] sm:$0xff] }
 0x176   : > { %1371 = vmatmul.msk.f32.gmra.mxu0 %vm703_vm0, %v2063_v10  ;;  %v875_v10 = vld [vmem:[#allocation11 + $0x38] sm:$0xff]  ;;  %1057 = vmatpush.msra.mxu1 %v887_v47 }
 0x177   : > { %1026 = vmatpush.msra.mxu0 %v879_v55  ;;  %930 = vmatpush.msra.mxu3 %v2087_v56  ;;  %v853_v55 = vld [vmem:[#allocation10 + $0x88] sm:$0xff] }
 0x178   : > { %1058 = vmatpush.msra.mxu1 %v886_v48  ;;  %964 = vmatpush.msrb.mxu2 %v859_v50 }
 0x179   : > { %1027 = vmatpush.msra.mxu0 %v878_v4  ;;  %931 = vmatpush.msra.mxu3 %v2091_v57  ;;  %v914_v4 = vld [vmem:[#allocation11 + $0x170] sm:$0xff] }
 0x17a   : > { %1369 = vmatmul.msk.f32.vlgmr.msra.gmra.mxu3 %vm637_vm1, %v2052_v3  ;;  %v845_v3 = vld [vmem:[#allocation10 + $0x48] sm:$0xff]  ;;  %1059 = vmatpush.msra.mxu1 %v885_v41 }
 0x17b   : > { %936 = vmatpush.msrb.mxu3 %v851_v58  ;;  %1028 = vmatpush.msra.mxu0 %v877_v59  ;;  %v913_v58 = vld [vmem:[#allocation11 + $0x168] sm:$0xff]  ;;  %v912_v59 = vld [vmem:[#allocation11 + $0x160] sm:$0xff] }
 0x17c   : > { %965 = vmatpush.msrb.mxu2 %v858_v51 }
 0x17d   : > { %937 = vmatpush.msrb.mxu3 %v850_v60  ;;  %1029 = vmatpush.msra.mxu0 %v876_v61  ;;  %v911_v60 = vld [vmem:[#allocation11 + $0x158] sm:$0xff]  ;;  %v910_v61 = vld [vmem:[#allocation11 + $0x150] sm:$0xff] }
 0x17e   : > { %966 = vmatpush.msrb.mxu2 %v857_v52 }
 0x17f   : > { %938 = vmatpush.msrb.mxu3 %v849_v62  ;;  %1030 = vmatpush.msra.mxu0 %v875_v10  ;;  %v909_v10 = vld [vmem:[#allocation11 + $0x148] sm:$0xff] }
 0x181   : > { %939 = vmatpush.msrb.mxu3 %v848_v63  ;;  %1031 = vmatpush.msra.mxu0 %v874_v5  ;;  %v908_v63 = vld [vmem:[#allocation11 + $0x140] sm:$0xff]  ;;  %v907_v5 = vld [vmem:[#allocation11 + $0x138] sm:$0xff] }
 0x183   : > { %940 = vmatpush.msrb.mxu3 %v847_v6  ;;  %1032 = vmatpush.msra.mxu0 %v873_v7  ;;  %v906_v6 = vld [vmem:[#allocation11 + $0x130] sm:$0xff]  ;;  %v905_v7 = vld [vmem:[#allocation11 + $0x128] sm:$0xff] }
 0x185   : > { %941 = vmatpush.msrb.mxu3 %v846_v8  ;;  %1033 = vmatpush.msra.mxu0 %v872_v9  ;;  %v904_v9 = vld [vmem:[#allocation11 + $0x120] sm:$0xff] }
 0x187   : > { %942 = vmatpush.msrb.mxu3 %v845_v3  ;;  %1034 = vmatpush.msra.mxu0 %v871_v11  ;;  %v903_v3 = vld [vmem:[#allocation11 + $0x118] sm:$0xff]  ;;  %v902_v11 = vld [vmem:[#allocation11 + $0x110] sm:$0xff] }
 0x189   : > { %943 = vmatpush.msrb.mxu3 %v844_v12  ;;  %1035 = vmatpush.msra.mxu0 %v870_v13  ;;  %v901_v12 = vld [vmem:[#allocation11 + $0x108] sm:$0xff]  ;;  %v900_v13 = vld [vmem:[#allocation11 + $0x100] sm:$0xff] }
 0x18b   : > { %944 = vmatpush.msrb.mxu3 %v843_v14  ;;  %1036 = vmatpush.msra.mxu0 %v869_v16 }
 0x18d   : > { %945 = vmatpush.msrb.mxu3 %v842_v17  ;;  %1037 = vmatpush.msra.mxu0 %v868_v18 }
 0x18e   : > { %1038 = vmatmul.f32.vlgmr.msra.gmra.mxu0 %v2091_v57 }
 0x18f   : > { %946 = vmatpush.msrb.mxu3 %v841_v21 }
 0x191   : > { %947 = vmatpush.msrb.mxu3 %v840_v24 }
 0x193   : > { %948 = vmatpush.msrb.mxu3 %v839_v27 }
 0x195   : > { %949 = vmatpush.msrb.mxu3 %v838_v30 }
 0x196   : > { %1041 = vmatmul.f32.gmra.mxu0 %v2087_v56 }
 0x197   : > { %950 = vmatpush.msrb.mxu3 %v837_v34 }
 0x199   : > { %951 = vmatpush.msrb.mxu3 %v836_v37 }
 0x19a   : > { %952 = vmatmul.f32.vlgmr.msrb.gmra.mxu3 %v833_v43  ;;  %v884_v43 = vld [vmem:[#allocation11 + $0x80] sm:$0xff] }
 0x19b   : > { %1013 = vmatpush.msra.mxu3 %v2087_v56  ;;  %1060 = vmatpush.msra.mxu1 %v884_v43  ;;  %v852_v56 = vld [vmem:[#allocation10 + $0x80] sm:$0xff] }
 0x19d   : > { %1014 = vmatpush.msra.mxu3 %v2091_v57 }
 0x1a2   : > { %1372 = vmatmul.msk.f32.vlgmr.msra.gmra.mxu3 %vm637_vm1, %v2066_v15  ;;  %v856_v15 = vld [vmem:[#allocation10 + $0xa0] sm:$0xff] }
 0x1a3   : > { %967 = vmatpush.msrb.mxu2 %v856_v15 }
 0x1a5   : > { %968 = vmatpush.msrb.mxu2 %v855_v53 }
 0x1a7   : > { %969 = vmatpush.msrb.mxu2 %v854_v54 }
 0x1a9   : > { %970 = vmatpush.msrb.mxu2 %v853_v55 }
 0x1aa   : > { %1373 = vmatmul.msk.f32.gmra.mxu3 %vm637_vm1, %v2073_v31  ;;  %v915_v31 = vld [vmem:[#allocation11 + $0x178] sm:$0xff] }
 0x1ab   : > { %971 = vmatpush.msrb.mxu2 %v852_v56 }
 0x1ad   : > { %1068 = vmatpush.msra.mxu2 %v915_v31 }
 0x1af   : > { %1069 = vmatpush.msra.mxu2 %v914_v4 }
 0x1b1   : > { %1070 = vmatpush.msra.mxu2 %v913_v58 }
 0x1b3   : > { %1071 = vmatpush.msra.mxu2 %v912_v59 }
 0x1b5   : > { %1072 = vmatpush.msra.mxu2 %v911_v60 }
 0x1b7   : > { %1073 = vmatpush.msra.mxu2 %v910_v61 }
 0x1b9   : > { %1074 = vmatpush.msra.mxu2 %v909_v10 }
 0x1bb   : > { %1075 = vmatpush.msra.mxu2 %v908_v63 }
 0x1bd   : > { %1076 = vmatpush.msra.mxu2 %v907_v5 }
 0x1bf   : > { %1077 = vmatpush.msra.mxu2 %v906_v6 }
 0x1c1   : > { %1078 = vmatpush.msra.mxu2 %v905_v7 }
 0x1c3   : > { %1079 = vmatpush.msra.mxu2 %v904_v9 }
 0x1c5   : > { %1080 = vmatpush.msra.mxu2 %v903_v3 }
 0x1c7   : > { %1081 = vmatpush.msra.mxu2 %v902_v11 }
 0x1c9   : > { %1082 = vmatpush.msra.mxu2 %v901_v12 }
 0x1cb   : > { %1083 = vmatpush.msra.mxu2 %v900_v13 }
 0x1eb   : > { %v993_v57 = vpop.f32.mrf.mxu0 }
 0x1ec   : > { %1061 = vmatmul.f32.vlgmr.msra.gmra.mxu1 %v993_v57 }
 0x1f3   : > { %v996_v62 = vpop.f32.mrf.mxu0 }
 0x1f4   : > { %1064 = vmatmul.f32.gmra.mxu1 %v996_v62 }
 0x1fd   : > { %v933_v8 = vpop.f32.mrf.mxu3 }
 0x1fe   : > { %972 = vmatmul.f32.vlgmr.msrb.gmra.mxu2 %v933_v8 }
 0x21d   : > { %v953_v14 = vpop.f32.mrf.mxu3 }
 0x225   : > { %v1016_v16 = vpop.f32.mrf.mxu3 }
 0x226   : > { %1084 = vmatmul.f32.vlgmr.msra.gmra.mxu2 %v1016_v16 }
 0x22d   : > { %v1019_v17 = vpop.f32.mrf.mxu3 }
 0x22e   : > { %1087 = vmatmul.f32.gmra.mxu2 %v1019_v17 }
 0x281   : > { %v973_v18 = vpop.f32.mrf.mxu2 }
 0x282   : > { %v974_v19 = vadd.f32 %v973_v18, %v953_v14 }
 0x284   : > { %v1091_v20 = vadd.f32 %v974_v19, %v2048_v2 }
 0x286   : > { %v1092_v21 = vmax.f32 %v1091_v20, 0.0 }
 0x288   : > { %1093 = vst [vmem:[%s531_s22] sm:$0xff] %v1092_v21 }
 0x289   : > { %1693 = shalt.err (!%p1690_p9)
}
 0x28a   : > { %1405 = dma.vmem_to_hbm [thread:$0]  (%p1945_p2), %s1119_s24, 128, %s1121_s27, %s1101_s15   ;;  %v1062_v2 = vpop.f32.mrf.mxu1  ;;  %v1039_v22 = vpop.f32.mrf.mxu0 }
 0x28b   : > { %v1063_v23 = vadd.f32 %v1062_v2, %v1039_v22  ;;  %s1384_s26 = sshll.u32 %s1869_s20, 4  ;;  %s538_s8 = scalar_lea.vmem [#allocation14], %s1352_s13 }
 0x28c   : > { %s1131_s17 = scalar_lea.hbm %s2171_s10, %s1384_s26  ;;  %s1132_s6 = sshll.u32 %s538_s8, 4  ;;  %s1133_s6 = int_to_ptr.vmem [resolvable:$true] %s1132_s6 }
 0x28d   : > { %s1134_s21 = sshll.u32 %s1131_s17, 4  ;;  %s1106_s20 = scalar_lea.sflag [#allocation15], %s2001_s12  ;;  %s1135_s21 = int_to_ptr.hbm [resolvable:$true] %s1134_s21 }
 0x28e   : > { %s1708_s22 = sshra.s32 %s1135_s21, 4  ;;  %s1714_s15 = scalar_lea.hbm %s2171_s10, 64  ;;  %s1709_s22 = int_to_ptr.hbm [resolvable:$true] %s1708_s22 }
 0x28f   : > { %s1710_s13 = scalar_lea.hbm %s1709_s22, 16  ;;  %p1715_p0 = scmp.lt.s32.totalorder %s1709_s22, %s2171_s10 }
 0x290   : > { %p1711_p10 = scmp.ne.s32.totalorder %s1709_s22, %s1710_s13  ;;  %p1716_p3 = scmp.lt.s32.totalorder %s1714_s15, %s1710_s13 }
 0x292   : > { %v1065_v27 = vpop.f32.mrf.mxu1  ;;  %v1042_v29 = vpop.f32.mrf.mxu0  ;;  %p1712_p12 = pnand %p1711_p10, %p1945_p2  ;;  %p1717_p1 = por %p1716_p3, %p1715_p0 }
 0x293   : > { %v1066_v30 = vadd.f32 %v1065_v27, %v1042_v29 }
 0x294   : > { %p1713_p13 = pneg %p1712_p12 }
 0x296   : > { %p1718_p11 = pnand %p1717_p1, %p1713_p13 }
 0x2a9   : > { %v1085_v24 = vpop.f32.mrf.mxu2 }
 0x2aa   : > { %v1086_v25 = vadd.f32 %v1085_v24, %v1063_v23 }
 0x2ac   : > { %v1094_v26 = vadd.f32 %v1086_v25, %v2046_v1 }
 0x2ae   : > { %v1096_v28 = vmax.f32 %v1094_v26, 0.0 }
 0x2b0   : > { %1098 = vst [vmem:[%s538_s8] sm:$0xff] %v1096_v28 }
 0x2b1   : > { %v1088_v32 = vpop.f32.mrf.mxu2 }
 0x2b2   : > { %v1089_v33 = vadd.f32 %v1088_v32, %v1066_v30 }
 0x2b4   : > { %v1095_v1 = vadd.f32 %v1089_v33, %v2044_v0 }
 0x2b6   : > { %v1097_v34 = vmax.f32 %v1095_v1, 0.0 }
 0x2b8   : > { %1099 = vst [vmem:[%s538_s8 + $0x8] sm:$0xff] %v1097_v34 }
 0x2b9   : > { %1721 = shalt.err (!%p1718_p11)
}
 0x2ba   : > { %s1788_s12 = smov 128   ;;  %s1789_s5 = smov 8  }
 0x2bb   : > { %1406 = dma.vmem_to_hbm [thread:$0]  (%p1945_p2), %s1133_s6, 256, %s1135_s21, %s1106_s20, %s1788_s12, %s1788_s12, %s1789_s5  }
 0x2bc PF: > { %s2201_s7 = sld [smem:[#allocation23_spill]]  ;;  %p1445_p5 = scmp.ge.s32.totalorder %s1780_s16, 2 }
 0x2be   : > { %p1430_p7 = pnand %p1445_p5, %p1949_p4 }
 0x2c0   : > { %p1431_p6 = pneg %p1430_p7 }
 0x2c2   : > { %s1149_s18 = sand.u32 1, %s2201_s7  }
 0x2c3   : > { %s1150_s30 = scalar_lea.sflag [#allocation4], %s1149_s18 }
 0x2c4   : > { %1759 = dma.done.wait (%p1431_p6), %s1150_s30, 128  }
 0x2c5   : > { %1761 = vsyncadd (%p1431_p6), %s1150_s30, 4294967168  ;;  %s1160_s26 = scalar_lea.sflag [#allocation15], %s1149_s18 }
 0x2c6   : > { %1763 = dma.done.wait (%p1431_p6), %s1160_s26, 256  }
 0x2c7   : > { %1765 = vsyncadd (%p1431_p6), %s1160_s26, 4294967040  ;;  %s2203_s16 = sld [smem:[#allocation25_spill]]  ;;  %s2206_s13 = smov %s1772_s14 }
 0x2c8   : > { %s2204_s8 = sld [smem:[#allocation24_spill]] }
 0x2c9   : > { %s2205_s15 = sld [smem:[#allocation26_spill]] }
 0x2cd   : > { %p32_p2 = scmp.ge.s32.totalorder %s2203_s16, 6  }
 0x2ce   : > { %s2207_s14 = smov %s2204_s8 }
 0x2cf   :  { %34 = sbr.rel (!%p32_p2) target bundleno = 16 (0x10), region = 156 }
 0x2d4   :  { %1166 = vsyncpa [#allocation3], 1 }
 0x2d5   :  { %1168 = vsyncpa [#allocation3 + $0x1], 1 }
 0x2d6   :  { %1169 = vsyncpa [#allocation6], 1 }
 0x2d7   :  { %1171 = vsyncpa [#allocation6 + $0x1], 1 }
 0x2d8   :  { %1172 = vsyncpa [#allocation9], 1 }
 0x2d9   :  { %1173 = vsyncpa [#allocation12], 1 }
 0x2da   :  { %1174 = vsyncpa [#allocation4], 1 }
 0x2db   :  { %1176 = vsyncpa [#allocation4 + $0x1], 1 }
 0x2dc   :  { %1177 = vsyncpa [#allocation15], 1 }
 0x2dd   :  { %1179 = vsyncpa [#allocation15 + $0x1], 1 }

</bundles_post_ra>
